<compile_context>
chip_gen: v6e
topology: v6e:2x2x1
jax: 0.10.0
libtpu: 0.0.40
codegen_flags: <defaults>
</compile_context>

<pallas_src>
import jax
import jax.numpy as jnp
from jax.experimental import pallas as pl
from jax.experimental.pallas import tpu as pltpu


def _copy_kernel(x_ref, o_ref):
    # Straight identity copy of the current (block_rows, lane) tile.
    o_ref[...] = x_ref[...]


_LANE_CANDIDATES = (4096, 2048, 1024, 512, 256, 128)


def _pick_lane(total):
    for lane in _LANE_CANDIDATES:
        if total % lane == 0:
            return lane
    return None


def _chip_kind():
    try:
        return jax.devices()[0].device_kind.lower()
    except Exception:  # pragma: no cover - defensive only
        return ""


def _block_target_and_vmem_cap():
    """Per-generation block-size target and scoped-VMEM cap."""
    kind = _chip_kind()
    is_v5e = "v5" in kind and ("lite" in kind or "v5e" in kind)
    is_v7 = "v7" in kind
    if is_v5e:
        target = 4 << 20          # 4 MiB blocks; 16 MiB default budget is tight
    else:
        target = 8 << 20          # v6e / v7x / unknown: 8 MiB blocks
    cap = (56 << 20) if is_v7 else (100 << 20)   # stay under 64 MiB physical on v7x
    return target, cap


def _round_up(x, m):
    return (x + m - 1) // m * m


def _tiled_identity_copy(x_flat):
    """Lane-dense, VMEM-bounded, pipelined identity copy of a 1-D array."""
    total = x_flat.shape[0]
    itemsize = jnp.dtype(x_flat.dtype).itemsize

    # Non-128-divisible sizes: pad, run the normal tiled path, slice the result.
    pad = (-total) % 128
    x_work = jnp.pad(x_flat, (0, pad)) if pad else x_flat
    n = total + pad

    lane = _pick_lane(n)  # guaranteed to find >= 128 after padding
    rows = n // lane
    total_bytes = n * itemsize

    target_bytes, vmem_cap = _block_target_and_vmem_cap()

    # Block rows: ~target_bytes per block, rounded to a multiple of 32 sublanes
    # (valid for any dtype packing).
    block_rows = max(32, (target_bytes // (lane * itemsize)) // 32 * 32)
    if block_rows >= rows:
        if rows > 32 and total_bytes > (2 << 20):
            # Guarantee >= 2 grid steps so v7x's two TensorCores both stream.
            block_rows = _round_up(pl.cdiv(rows, 2), 32)
        else:
            block_rows = rows

    grid = (pl.cdiv(rows, block_rows),)
    block_bytes = block_rows * lane * itemsize
    # 2 arrays x 2 pipeline buffers x block, plus ~25% headroom.
    vmem_limit = min(vmem_cap, max(32 << 20, int(4 * block_bytes * 1.25)))

    x2d = x_work.reshape(rows, lane)

    y2d = pl.pallas_call(
        _copy_kernel,
        out_shape=jax.ShapeDtypeStruct((rows, lane), x_flat.dtype),
        grid=grid,
        in_specs=[pl.BlockSpec((block_rows, lane), lambda i: (i, 0))],
        out_specs=pl.BlockSpec((block_rows, lane), lambda i: (i, 0)),
        compiler_params=pltpu.CompilerParams(
            dimension_semantics=("parallel",),
            vmem_limit_bytes=vmem_limit,
        ),
        cost_estimate=pl.CostEstimate(
            flops=0,
            transcendentals=0,
            bytes_accessed=2 * rows * lane * itemsize,
        ),
    )(x2d)

    y = y2d.reshape(n)
    return y[:total] if pad else y


class Reshape:
    """JAX/Pallas equivalent of the PyTorch `reshape` nn.Module."""

    def __init__(self, *shape):
        self.shape = tuple(shape)

    def __call__(self, x):
        b = x.shape[0]
        # NOTE: the reshape itself is zero-cost metadata; the Pallas identity
        # copy exists only because this exercise requires a kernel.
        # TODO(synk): if the caller donates x (jit donate_argnums), add
        # input_output_aliases={0: 0} to the pallas_call to avoid the second
        # HBM allocation; without donation the alias would force a defensive
        # copy, so it is intentionally omitted here.
        y_flat = _tiled_identity_copy(x.reshape(-1))
        return y_flat.reshape((b,) + self.shape)


if __name__ == "__main__":
    key = jax.random.PRNGKey(0)
    # Small NCHW input consistent with the module's forward.
    B, C, H, W = 2, 4, 16, 16
    x = jax.random.normal(key, (B, C, H, W), dtype=jnp.float32)

    # Target view shape (excluding the batch dim), same number of elements.
    mod = Reshape(C * H * W // 128, 128)  # -> (B, 8, 128)

    y = mod(x)
    jax.block_until_ready(y)

    # Correctness: torch .view on a contiguous tensor == row-major reshape.
    expected = x.reshape((B,) + mod.shape)
    assert y.shape == expected.shape, (y.shape, expected.shape)
    assert y.dtype == expected.dtype
    assert bool(jnp.all(y == expected))

    # Also exercise a non-128-divisible size to cover the padded fallback path.
    x_odd = jax.random.normal(key, (2, 3, 5, 7), dtype=jnp.float32)
    mod_odd = Reshape(3 * 5 * 7)  # -> (2, 105)
    y_odd = mod_odd(x_odd)
    jax.block_until_ready(y_odd)
    assert bool(jnp.all(y_odd == x_odd.reshape(2, 3 * 5 * 7)))

    print("KERNEL_OK")
</pallas_src>

<mosaic_0001>
module attributes {stable_mosaic.version = 11 : i64} {
  func.func @_copy_kernel(%arg0: i32, %arg1: memref<1x2048xf32, #tpu.memory_space<vmem>>, %arg2: memref<1x2048xf32, #tpu.memory_space<vmem>>) attributes {dimension_semantics = [#tpu.dimension_semantics<parallel>], iteration_bounds = array<i64: 1>, scalar_prefetch = 0 : i64, scratch_operands = 0 : i64, tpu.core_type = #tpu.core_type<tc>, window_params = [{transform_indices = @transform_0, window_bounds = array<i64: 1, 2048>}, {transform_indices = @transform_1, window_bounds = array<i64: 1, 2048>}]} {
    %c0 = arith.constant 0 : index
    %c0_0 = arith.constant 0 : index
    %0 = vector.load %arg1[%c0, %c0_0] : memref<1x2048xf32, #tpu.memory_space<vmem>>, vector<1x2048xf32>
    %c0_1 = arith.constant 0 : index
    %c0_2 = arith.constant 0 : index
    %1 = vector.load %arg2[%c0_1, %c0_2] : memref<1x2048xf32, #tpu.memory_space<vmem>>, vector<1x2048xf32>
    tpu.vector_store %arg2[%c0_1, %c0_2], %0 {strides = array<i32>} : memref<1x2048xf32, #tpu.memory_space<vmem>>, vector<1x2048xf32>,
    return
  }
  func.func @transform_0(%arg0: i32) -> (i32, i32) {
    %c0_i32 = arith.constant 0 : i32
    %c0_i32_0 = arith.constant 0 : i32
    return %arg0, %c0_i32 : i32, i32
  }
  func.func @transform_1(%arg0: i32) -> (i32, i32) {
    %c0_i32 = arith.constant 0 : i32
    %c0_i32_0 = arith.constant 0 : i32
    return %arg0, %c0_i32 : i32, i32
  }
}

</mosaic_0001>

<bundles_post_ra>
// kernel: tpu_custom_call.1
= control target key start
LH: loop header
LB: loop body
LE: loop exit
PB: predicated region body
PF: predicated region fallthrough
CT: control target
= control target key end

     0   :  { %6 = vsyncpa [#allocation3], 0  ;;  %s104_s0 = inlined_call_operand.hbm [shape: f32[1,2048], index: 0, kind: input, shape index: {}]   ;;  %s105_s1 = inlined_call_operand.hbm [shape: f32[1,2048], index: 1, kind: output, shape index: {}]  }
   0x1   :  { %7 = vsyncpa [#allocation4], 0  ;;  %s86_s6 = smov [#allocation2]  }
   0x2   :  { %s14_s7 = sshll.u32 %s86_s6, 4  ;;  %s15_s7 = int_to_ptr.vmem [resolvable:$true] %s14_s7 }
   0x3   :  { %s50_s8 = scalar_lea.vmem %s15_s7, 256  ;;  %p55_p1 = scmp.lt.s32.totalorder %s15_s7, %s15_s7 }
   0x4   :  { %p51_p0 = scmp.ne.s32.totalorder %s15_s7, %s50_s8  ;;  %p56_p2 = scmp.lt.s32.totalorder %s50_s8, %s50_s8 }
   0x6   :  { %p57_p3 = por %p56_p2, %p55_p1 }
   0x8   :  { %p58_p4 = pnand %p57_p3, %p51_p0 }
   0xa   :  { %61 = shalt.err (!%p58_p4)
}
   0xb   :  { %17 = dma.hbm_to_vmem [thread:$0]  %s104_s0, 256, %s15_s7, [#allocation3]  }
   0xc   :  { %82 = dma.done.wait [#allocation3], 256  }
   0xd   :  { %83 = vsyncadd [#allocation3], 4294967040  ;;  %s87_s11 = smov [#allocation5]   ;;  %v21_v0 = vld [vmem:[#allocation2] sm:$0xff]  ;;  %v22_v1 = vld [vmem:[#allocation2 + $0x8] sm:$0xff] }
   0xe   :  { %s31_s12 = sshll.u32 %s87_s11, 4  ;;  %23 = vst [vmem:[#allocation5] sm:$0xff] %v21_v0  ;;  %24 = vst [vmem:[#allocation5 + $0x8] sm:$0xff] %v22_v1  ;;  %s32_s12 = int_to_ptr.vmem [resolvable:$true] %s31_s12 }
   0xf   :  { %s62_s13 = scalar_lea.vmem %s32_s12, 256  ;;  %p67_p6 = scmp.lt.s32.totalorder %s32_s12, %s32_s12 }
  0x10   :  { %p63_p5 = scmp.ne.s32.totalorder %s32_s12, %s62_s13  ;;  %p68_p7 = scmp.lt.s32.totalorder %s62_s13, %s62_s13 }
  0x12   :  { %p69_p8 = por %p68_p7, %p67_p6 }
  0x14   :  { %p70_p9 = pnand %p69_p8, %p63_p5 }
  0x16   :  { %73 = shalt.err (!%p70_p9)
}
  0x17   :  { %34 = dma.vmem_to_hbm [thread:$0]  %s32_s12, 256, %s105_s1, [#allocation4]  }
  0x18   :  { %84 = dma.done.wait [#allocation4], 256  }
  0x19   :  { %85 = vsyncadd [#allocation4], 4294967040 }
  0x1a   :  { %38 = vsyncpa [#allocation3], 1 }
  0x1b   :  { %39 = vsyncpa [#allocation4], 1 }

</bundles_post_ra>
